<compile_context>
chip_gen: v7x
topology: tpu7x:2x2x1
jax: 0.10.0
libtpu: 0.0.40
codegen_flags: <defaults>
</compile_context>

<pallas_src>
from typing import NamedTuple

import jax
import jax.numpy as jnp
from jax.experimental import pallas as pl
from jax.experimental.pallas import tpu as pltpu


def _round_up(x, m):
    return (x + m - 1) // m * m


# --------------------------------------------------------------------------- #
# Kernel
# --------------------------------------------------------------------------- #
def _mlp_kernel(x_ref, w1_ref, b1_ref, w2_ref, b2_ref, w3_ref, b3_ref, o_ref):
    # Layer 1: cast the f32 x tile to bf16 in-kernel (K = n_in is unpadded;
    # Mosaic handles the internal layout padding of the small contraction).
    x_bf = x_ref[...].astype(jnp.bfloat16)
    h1 = jnp.dot(x_bf, w1_ref[...], preferred_element_type=jnp.float32)
    h1 = jnp.maximum(h1 + b1_ref[...], 0.0).astype(jnp.bfloat16)
    # Layer 2: (TB, 512) @ (512, 512) -> f32 acc, bias + ReLU on VPU.
    h2 = jnp.dot(h1, w2_ref[...], preferred_element_type=jnp.float32)
    h2 = jnp.maximum(h2 + b2_ref[...], 0.0).astype(jnp.bfloat16)
    # Layer 3: (TB, 512) @ (512, N_pad) -> f32 acc, bias; lane-dense store.
    out = jnp.dot(h2, w3_ref[...], preferred_element_type=jnp.float32) + b3_ref[...]
    o_ref[...] = out.astype(o_ref.dtype)


# --------------------------------------------------------------------------- #
# One-time parameter preparation (hoisted out of the per-call wrapper)
# --------------------------------------------------------------------------- #
class PreparedParams(NamedTuple):
    w1: jax.Array   # (n_in, 512)      bf16
    b1: jax.Array   # (1, 512)         f32
    w2: jax.Array   # (512, 512)       bf16
    b2: jax.Array   # (1, 512)         f32
    w3: jax.Array   # (512, n_out_pad) bf16  (columns zero-padded to 128)
    b3: jax.Array   # (1, n_out_pad)   f32   (zero-padded)
    n_classes: int


def prepare_params(params):
    """Cast/pad the weights once; reuse the result for every forward call."""
    w1, b1, w2, b2, w3, b3 = params
    hidden = w1.shape[1]
    n_classes = w3.shape[1]
    n_out_pad = _round_up(n_classes, 128)   # lane-dense, unmasked output stores

    w1p = w1.astype(jnp.bfloat16)
    w2p = w2.astype(jnp.bfloat16)
    w3p = jnp.pad(w3, ((0, 0), (0, n_out_pad - n_classes))).astype(jnp.bfloat16)

    b1r = b1.reshape(1, hidden).astype(jnp.float32)
    b2r = b2.reshape(1, hidden).astype(jnp.float32)
    b3r = jnp.pad(b3, (0, n_out_pad - n_classes)).reshape(1, n_out_pad)
    b3r = b3r.astype(jnp.float32)

    return PreparedParams(w1p, b1r, w2p, b2r, w3p, b3r, n_classes)


# --------------------------------------------------------------------------- #
# Batch tiling chooser (v7x megacore aware)
# --------------------------------------------------------------------------- #
def _choose_tiling(batch, tile_b_max):
    """Returns (tile_b, padded_batch, n_tiles).

    - tile_b is a multiple of 8 (f32 sublane) and padded_batch = n_tiles*tile_b.
    - If there is enough work to split (>= 512 padded rows), the tile count is
      made >= 2 and even so the "parallel" grid axis feeds both v7x TensorCores
      without adding a full extra tile of padded work.
    """
    tile_b_max = max(8, _round_up(tile_b_max, 8))
    pb = _round_up(max(batch, 1), 8)

    n_tiles = -(-pb // tile_b_max)            # ceil division
    if n_tiles == 1 and pb >= 512:
        n_tiles = 2                           # give each TensorCore a tile
    if n_tiles > 1 and n_tiles % 2 == 1:
        n_tiles += 1                          # even split, same total work

    tile_b = _round_up(-(-pb // n_tiles), 8)
    padded_batch = n_tiles * tile_b
    return tile_b, padded_batch, n_tiles


# --------------------------------------------------------------------------- #
# Forward wrapper
# --------------------------------------------------------------------------- #
def aug_classification_forward(x, p: PreparedParams, *, tile_b_max=1024):
    """x: (batch, n_components, n_dim) float32. Returns (batch, n_classes) f32."""
    batch = x.shape[0]
    n_in = p.w1.shape[0]
    n_out_pad = p.w3.shape[1]

    tile_b, padded_batch, n_tiles = _choose_tiling(batch, tile_b_max)

    # Flatten exactly like torch's x.reshape(-1, n_dim * n_components).
    # Keep f32 and unpadded in K; the bf16 cast happens inside the kernel.
    x2d = x.reshape(batch, n_in)
    if padded_batch != batch:
        x2d = jnp.pad(x2d, ((0, padded_batch - batch), (0, 0)))

    # Weights/biases: constant index_map -> VMEM-resident across grid steps.
    def resident(arr):
        return pl.BlockSpec(arr.shape, lambda i: (0,) * arr.ndim)

    # Raise v5e's 16 MiB default scoped-VMEM limit only when the batch tile is
    # big enough to need it (32 MiB is already the default on v6e/v7x).
    vmem_limit = 32 * 1024 * 1024 if tile_b > 512 else None

    out_padded = pl.pallas_call(
        _mlp_kernel,
        out_shape=jax.ShapeDtypeStruct((padded_batch, n_out_pad), jnp.float32),
        grid_spec=pltpu.PrefetchScalarGridSpec(
            num_scalar_prefetch=0,
            grid=(n_tiles,),
            in_specs=[
                pl.BlockSpec((tile_b, n_in), lambda i: (i, 0)),   # x tile
                resident(p.w1),
                resident(p.b1),
                resident(p.w2),
                resident(p.b2),
                resident(p.w3),
                resident(p.b3),
            ],
            out_specs=pl.BlockSpec((tile_b, n_out_pad), lambda i: (i, 0)),
        ),
        compiler_params=pltpu.CompilerParams(
            dimension_semantics=("parallel",),
            vmem_limit_bytes=vmem_limit,
        ),
    )(x2d, p.w1, p.b1, p.w2, p.b2, p.w3, p.b3)

    return out_padded[:batch, :p.n_classes]


# --------------------------------------------------------------------------- #
# Synthetic init + pure-JAX reference
# --------------------------------------------------------------------------- #
def init_params(key, n_dim, n_components, n_classes, hidden=512):
    """Deterministic synthetic init (uniform, roughly torch Linear scale)."""
    n_in = n_dim * n_components
    ks = jax.random.split(key, 6)

    def lin(kw, kb, fan_in, fan_out):
        bound = 1.0 / jnp.sqrt(fan_in)
        w = jax.random.uniform(kw, (fan_in, fan_out), jnp.float32, -bound, bound)
        b = jax.random.uniform(kb, (fan_out,), jnp.float32, -bound, bound)
        return w, b

    w1, b1 = lin(ks[0], ks[1], n_in, hidden)
    w2, b2 = lin(ks[2], ks[3], hidden, hidden)
    w3, b3 = lin(ks[4], ks[5], hidden, n_classes)
    return (w1, b1, w2, b2, w3, b3)


def _reference(x, params):
    """Pure-f32 JAX reference with the original module semantics."""
    w1, b1, w2, b2, w3, b3 = params
    h = x.reshape(x.shape[0], -1)
    h = jnp.maximum(h @ w1 + b1, 0.0)
    h = jnp.maximum(h @ w2 + b2, 0.0)
    return h @ w3 + b3


if __name__ == "__main__":
    n_dim, n_components, n_classes = 4, 8, 10
    batch = 2

    key = jax.random.PRNGKey(0)
    k_x, k_p = jax.random.split(key)
    x = jax.random.normal(k_x, (batch, n_components, n_dim), dtype=jnp.float32)
    params = init_params(k_p, n_dim, n_components, n_classes)
    prepared = prepare_params(params)   # one-time weight cast/pad

    out = aug_classification_forward(x, prepared)
    out = jax.block_until_ready(out)

    ref = _reference(x, params)
    assert out.shape == (batch, n_classes)
    # bf16 MXU inputs / bf16 inter-layer activations with f32 accumulation ->
    # intentionally loose tolerance vs the f32 reference.
    assert jnp.allclose(out, ref, atol=3e-2, rtol=3e-2), (
        f"max abs err = {jnp.max(jnp.abs(out - ref))}"
    )

    print("KERNEL_OK")
</pallas_src>

<mosaic_0001>
module attributes {stable_mosaic.version = 11 : i64} {
  func.func @_mlp_kernel(%arg0: i32, %arg1: memref<8x32xf32, #tpu.memory_space<vmem>>, %arg2: memref<32x512xbf16, #tpu.memory_space<vmem>>, %arg3: memref<1x512xf32, #tpu.memory_space<vmem>>, %arg4: memref<512x512xbf16, #tpu.memory_space<vmem>>, %arg5: memref<1x512xf32, #tpu.memory_space<vmem>>, %arg6: memref<512x128xbf16, #tpu.memory_space<vmem>>, %arg7: memref<1x128xf32, #tpu.memory_space<vmem>>, %arg8: memref<8x128xf32, #tpu.memory_space<vmem>>) attributes {dimension_semantics = [#tpu.dimension_semantics<parallel>], iteration_bounds = array<i64: 1>, scalar_prefetch = 0 : i64, scratch_operands = 0 : i64, tpu.core_type = #tpu.core_type<tc>, window_params = [{transform_indices = @transform_0, window_bounds = array<i64: 8, 32>}, {pipeline_mode = #tpu.pipeline_mode<synchronous>, transform_indices = @transform_1, window_bounds = array<i64: 32, 512>}, {pipeline_mode = #tpu.pipeline_mode<synchronous>, transform_indices = @transform_2, window_bounds = array<i64: 1, 512>}, {pipeline_mode = #tpu.pipeline_mode<synchronous>, transform_indices = @transform_3, window_bounds = array<i64: 512, 512>}, {pipeline_mode = #tpu.pipeline_mode<synchronous>, transform_indices = @transform_4, window_bounds = array<i64: 1, 512>}, {pipeline_mode = #tpu.pipeline_mode<synchronous>, transform_indices = @transform_5, window_bounds = array<i64: 512, 128>}, {pipeline_mode = #tpu.pipeline_mode<synchronous>, transform_indices = @transform_6, window_bounds = array<i64: 1, 128>}, {transform_indices = @transform_7, window_bounds = array<i64: 8, 128>}]} {
    %c0 = arith.constant 0 : index
    %c0_0 = arith.constant 0 : index
    %0 = vector.load %arg1[%c0, %c0_0] : memref<8x32xf32, #tpu.memory_space<vmem>>, vector<8x32xf32>
    %1 = arith.truncf %0 : vector<8x32xf32> to vector<8x32xbf16>
    %c0_1 = arith.constant 0 : index
    %c0_2 = arith.constant 0 : index
    %2 = vector.load %arg2[%c0_1, %c0_2] : memref<32x512xbf16, #tpu.memory_space<vmem>>, vector<32x512xbf16>
    %cst = arith.constant dense<0.000000e+00> : vector<8x512xf32>
    %3 = tpu.matmul %1, %2, %cst {dimension_numbers = #tpu.dot_dimension_numbers<[1], [0], [0], [1], [0, 0, 1, 1], [], []>} : vector<8x32xbf16>, vector<32x512xbf16>, vector<8x512xf32> -> vector<8x512xf32>
    %c0_3 = arith.constant 0 : index
    %c0_4 = arith.constant 0 : index
    %4 = vector.load %arg3[%c0_3, %c0_4] : memref<1x512xf32, #tpu.memory_space<vmem>>, vector<1x512xf32>
    %5 = vector.broadcast %4 : vector<1x512xf32> to vector<8x512xf32>
    %6 = arith.addf %3, %5 : vector<8x512xf32>
    %cst_5 = arith.constant 0.000000e+00 : f32
    %7 = vector.broadcast %cst_5 : f32 to vector<8x512xf32>
    %8 = arith.maximumf %6, %7 : vector<8x512xf32>
    %9 = arith.truncf %8 : vector<8x512xf32> to vector<8x512xbf16>
    %c0_6 = arith.constant 0 : index
    %c0_7 = arith.constant 0 : index
    %10 = vector.load %arg4[%c0_6, %c0_7] : memref<512x512xbf16, #tpu.memory_space<vmem>>, vector<512x512xbf16>
    %cst_8 = arith.constant dense<0.000000e+00> : vector<8x512xf32>
    %11 = tpu.matmul %9, %10, %cst_8 {dimension_numbers = #tpu.dot_dimension_numbers<[1], [0], [0], [1], [0, 0, 1, 1], [], []>} : vector<8x512xbf16>, vector<512x512xbf16>, vector<8x512xf32> -> vector<8x512xf32>
    %c0_9 = arith.constant 0 : index
    %c0_10 = arith.constant 0 : index
    %12 = vector.load %arg5[%c0_9, %c0_10] : memref<1x512xf32, #tpu.memory_space<vmem>>, vector<1x512xf32>
    %13 = vector.broadcast %12 : vector<1x512xf32> to vector<8x512xf32>
    %14 = arith.addf %11, %13 : vector<8x512xf32>
    %cst_11 = arith.constant 0.000000e+00 : f32
    %15 = vector.broadcast %cst_11 : f32 to vector<8x512xf32>
    %16 = arith.maximumf %14, %15 : vector<8x512xf32>
    %17 = arith.truncf %16 : vector<8x512xf32> to vector<8x512xbf16>
    %c0_12 = arith.constant 0 : index
    %c0_13 = arith.constant 0 : index
    %18 = vector.load %arg6[%c0_12, %c0_13] : memref<512x128xbf16, #tpu.memory_space<vmem>>, vector<512x128xbf16>
    %cst_14 = arith.constant dense<0.000000e+00> : vector<8x128xf32>
    %19 = tpu.matmul %17, %18, %cst_14 {dimension_numbers = #tpu.dot_dimension_numbers<[1], [0], [0], [1], [0, 0, 1, 1], [], []>} : vector<8x512xbf16>, vector<512x128xbf16>, vector<8x128xf32> -> vector<8x128xf32>
    %c0_15 = arith.constant 0 : index
    %c0_16 = arith.constant 0 : index
    %20 = vector.load %arg7[%c0_15, %c0_16] : memref<1x128xf32, #tpu.memory_space<vmem>>, vector<1x128xf32>
    %21 = vector.broadcast %20 : vector<1x128xf32> to vector<8x128xf32>
    %22 = arith.addf %19, %21 : vector<8x128xf32>
    %c0_17 = arith.constant 0 : index
    %c0_18 = arith.constant 0 : index
    %23 = vector.load %arg8[%c0_17, %c0_18] : memref<8x128xf32, #tpu.memory_space<vmem>>, vector<8x128xf32>
    tpu.vector_store %arg8[%c0_17, %c0_18], %22 {strides = array<i32>} : memref<8x128xf32, #tpu.memory_space<vmem>>, vector<8x128xf32>,
    return
  }
  func.func @transform_0(%arg0: i32) -> (i32, i32) {
    %c0_i32 = arith.constant 0 : i32
    %c0_i32_0 = arith.constant 0 : i32
    return %arg0, %c0_i32 : i32, i32
  }
  func.func @transform_1(%arg0: i32) -> (i32, i32) {
    %c0_i32 = arith.constant 0 : i32
    %c0_i32_0 = arith.constant 0 : i32
    %c0_i32_1 = arith.constant 0 : i32
    return %c0_i32, %c0_i32_0 : i32, i32
  }
  func.func @transform_2(%arg0: i32) -> (i32, i32) {
    %c0_i32 = arith.constant 0 : i32
    %c0_i32_0 = arith.constant 0 : i32
    %c0_i32_1 = arith.constant 0 : i32
    return %c0_i32, %c0_i32_0 : i32, i32
  }
  func.func @transform_3(%arg0: i32) -> (i32, i32) {
    %c0_i32 = arith.constant 0 : i32
    %c0_i32_0 = arith.constant 0 : i32
    %c0_i32_1 = arith.constant 0 : i32
    return %c0_i32, %c0_i32_0 : i32, i32
  }
  func.func @transform_4(%arg0: i32) -> (i32, i32) {
    %c0_i32 = arith.constant 0 : i32
    %c0_i32_0 = arith.constant 0 : i32
    %c0_i32_1 = arith.constant 0 : i32
    return %c0_i32, %c0_i32_0 : i32, i32
  }
  func.func @transform_5(%arg0: i32) -> (i32, i32) {
    %c0_i32 = arith.constant 0 : i32
    %c0_i32_0 = arith.constant 0 : i32
    %c0_i32_1 = arith.constant 0 : i32
    return %c0_i32, %c0_i32_0 : i32, i32
  }
  func.func @transform_6(%arg0: i32) -> (i32, i32) {
    %c0_i32 = arith.constant 0 : i32
    %c0_i32_0 = arith.constant 0 : i32
    %c0_i32_1 = arith.constant 0 : i32
    return %c0_i32, %c0_i32_0 : i32, i32
  }
  func.func @transform_7(%arg0: i32) -> (i32, i32) {
    %c0_i32 = arith.constant 0 : i32
    %c0_i32_0 = arith.constant 0 : i32
    return %arg0, %c0_i32 : i32, i32
  }
}

</mosaic_0001>

<bundles_post_ra>
// kernel: tpu_custom_call.1
= control target key start
LH: loop header
LB: loop body
LE: loop exit
PB: predicated region body
PF: predicated region fallthrough
CT: control target
= control target key end

     0   :  { %12 = vsyncpa [#allocation3], 0  ;;  %s2317_s0 = inlined_call_operand.hbm [shape: f32[8,32], index: 0, kind: input, shape index: {}]   ;;  %s2318_s1 = inlined_call_operand.hbm [shape: bf16[32,512], index: 1, kind: input, shape index: {}]   ;;  %s2319_s2 = inlined_call_operand.vmem [shape: f32[1,512], index: 2, kind: input, shape index: {}]   ;;  %s2320_s3 = inlined_call_operand.hbm [shape: bf16[512,512], index: 3, kind: input, shape index: {}]   ;;  %s2321_s4 = inlined_call_operand.vmem [shape: f32[1,512], index: 4, kind: input, shape index: {}]   ;;  %s2322_s5 = inlined_call_operand.hbm [shape: bf16[512,128], index: 5, kind: input, shape index: {}]   ;;  %s2323_s6 = inlined_call_operand.vmem [shape: f32[1,128], index: 6, kind: input, shape index: {}]   ;;  %s2324_s7 = inlined_call_operand.hbm [shape: f32[8,128], index: 7, kind: output, shape index: {}]  }
   0x1   :  { %13 = vsyncpa [#allocation6], 0 }
   0x2   :  { %14 = vsyncpa [#allocation9], 0 }
   0x3   :  { %15 = vsyncpa [#allocation4], 0  ;;  %s2161_s24 = smov [#allocation5]   ;;  %s2043_s28 = scalar_lea.hbm %s2318_s1, 1024 }
   0x4   :  { %s31_s25 = sshll.u32 %s2161_s24, 4  ;;  %p2044_p0 = scmp.ne.s32.totalorder %s2318_s1, %s2043_s28  ;;  %s32_s25 = int_to_ptr.vmem [resolvable:$true] %s31_s25 }
   0x5   :  { %p2047_p1 = scmp.lt.u32.totalorder %s2043_s28, %s2318_s1 }
   0x7   :  { %p2049_p2 = pnand %p2047_p1, %p2044_p0 }
   0x9   :  { %2052 = shalt.err (!%p2049_p2)
}
   0xa   :  { %s2053_s10 = scalar_lea.vmem %s32_s25, 1024  ;;  %p2058_p4 = scmp.lt.s32.totalorder %s32_s25, %s32_s25 }
   0xb   :  { %p2054_p3 = scmp.ne.s32.totalorder %s32_s25, %s2053_s10  ;;  %p2059_p5 = scmp.lt.s32.totalorder %s2053_s10, %s2053_s10 }
   0xd   :  { %p2060_p6 = por %p2059_p5, %p2058_p4 }
   0xf   :  { %p2061_p7 = pnand %p2060_p6, %p2054_p3 }
  0x11   :  { %2064 = shalt.err (!%p2061_p7)
}
  0x12   :  { %s2162_s11 = smov 256   ;;  %s2163_s12 = smov 16  }
  0x13   :  { %37 = dma.hbm_to_vmem [thread:$0]  %s2318_s1, 1024, %s32_s25, [#allocation6], %s2162_s11, %s2162_s11, %s2163_s12  }
  0x14   :  { %s2164_s15 = smov [#allocation2]   ;;  %s2165_s17 = smov [#allocation7]  }
  0x15   :  { %s22_s16 = sshll.u32 %s2164_s15, 4  ;;  %s45_s18 = sshll.u32 %s2165_s17, 4  ;;  %s23_s16 = int_to_ptr.vmem [resolvable:$true] %s22_s16  ;;  %s46_s18 = int_to_ptr.vmem [resolvable:$true] %s45_s18 }
  0x16   :  { %s2065_s21 = scalar_lea.hbm %s2317_s0, 128 }
  0x17   :  { %p2066_p8 = scmp.ne.s32.totalorder %s2317_s0, %s2065_s21  ;;  %p2069_p9 = scmp.lt.u32.totalorder %s2065_s21, %s2317_s0 }
  0x19   :  { %p2071_p10 = pnand %p2069_p9, %p2066_p8 }
  0x1b   :  { %2074 = shalt.err (!%p2071_p10)
}
  0x1c   :  { %s2075_s1 = scalar_lea.vmem %s23_s16, 128  ;;  %p2080_p12 = scmp.lt.s32.totalorder %s23_s16, %s23_s16 }
  0x1d   :  { %p2076_p11 = scmp.ne.s32.totalorder %s23_s16, %s2075_s1  ;;  %p2081_p13 = scmp.lt.s32.totalorder %s2075_s1, %s2075_s1 }
  0x1f   :  { %p2082_p0 = por %p2081_p13, %p2080_p12 }
  0x21   :  { %p2083_p1 = pnand %p2082_p0, %p2076_p11 }
  0x23   :  { %2086 = shalt.err (!%p2083_p1)
}
  0x24   :  { %25 = dma.hbm_to_vmem [thread:$0]  %s2317_s0, 128, %s23_s16, [#allocation3]  }
  0x25   :  { %s2087_s30 = scalar_lea.hbm %s2320_s3, 16384 }
  0x26   :  { %p2088_p2 = scmp.ne.s32.totalorder %s2320_s3, %s2087_s30  ;;  %p2091_p3 = scmp.lt.u32.totalorder %s2087_s30, %s2320_s3 }
  0x28   :  { %p2093_p4 = pnand %p2091_p3, %p2088_p2 }
  0x2a   :  { %2096 = shalt.err (!%p2093_p4)
}
  0x2b   :  { %s2097_s14 = scalar_lea.vmem %s46_s18, 16384  ;;  %p2102_p6 = scmp.lt.s32.totalorder %s46_s18, %s46_s18 }
  0x2c   :  { %p2098_p5 = scmp.ne.s32.totalorder %s46_s18, %s2097_s14  ;;  %p2103_p7 = scmp.lt.s32.totalorder %s2097_s14, %s2097_s14 }
  0x2e   :  { %p2104_p8 = por %p2103_p7, %p2102_p6 }
  0x30   :  { %p2105_p9 = pnand %p2104_p8, %p2098_p5 }
  0x32   :  { %2108 = shalt.err (!%p2105_p9)
}
  0x33   :  { %51 = dma.hbm_to_vmem [thread:$0]  %s2320_s3, 16384, %s46_s18, [#allocation6], %s2162_s11, %s2162_s11, %s2163_s12  }
  0x34   :  { %s2166_s16 = smov [#allocation8]   ;;  %s2109_s21 = scalar_lea.hbm %s2322_s5, 4096 }
  0x35   :  { %s59_s17 = sshll.u32 %s2166_s16, 4  ;;  %p2110_p10 = scmp.ne.s32.totalorder %s2322_s5, %s2109_s21  ;;  %s60_s17 = int_to_ptr.vmem [resolvable:$true] %s59_s17 }
  0x36   :  { %p2113_p11 = scmp.lt.u32.totalorder %s2109_s21, %s2322_s5 }
  0x38   :  { %p2115_p12 = pnand %p2113_p11, %p2110_p10 }
  0x3a   :  { %2118 = shalt.err (!%p2115_p12)
}
  0x3b   :  { %s2119_s1 = scalar_lea.vmem %s60_s17, 4096  ;;  %p2124_p0 = scmp.lt.s32.totalorder %s60_s17, %s60_s17 }
  0x3c   :  { %p2120_p13 = scmp.ne.s32.totalorder %s60_s17, %s2119_s1  ;;  %p2125_p1 = scmp.lt.s32.totalorder %s2119_s1, %s2119_s1 }
  0x3e   :  { %p2126_p2 = por %p2125_p1, %p2124_p0 }
  0x40   :  { %p2127_p3 = pnand %p2126_p2, %p2120_p13 }
  0x42   :  { %2130 = shalt.err (!%p2127_p3)
}
  0x43   :  { %s2167_s3 = smov 64   ;;  %s2168_s11 = smov 4  }
  0x44   :  { %65 = dma.hbm_to_vmem [thread:$0]  %s2322_s5, 4096, %s60_s17, [#allocation9], %s2167_s3, %s2167_s3, %s2168_s11  }
  0x45   :  { %2153 = dma.done.wait [#allocation3], 128  }
  0x46   :  { %2154 = vsyncadd [#allocation3], 4294967168 }
  0x47   :  { %2155 = dma.done.wait [#allocation6], 17408  }
  0x48   :  { %2156 = vsyncadd [#allocation6], 4294949888 }
  0x49   :  { %2157 = dma.done.wait [#allocation9], 4096  }
  0x4a   :  { %2158 = vsyncadd [#allocation9], 4294963200  ;;  %v2169_v0 = vmov 0   ;;  %v1807_v1 = vld [vmem:[#allocation5 + $0x4] ss:$16 sps:$4 sm:$0xff]   ;;  %v81_v5 = vld [vmem:[#allocation2] sm:$0xff] }
  0x4b   :  { %189 = vmatprep.mubr.bf16.mxu0 %v2169_v0  ;;  %230 = vmatprep.mubr.bf16.mxu1 %v2169_v0  ;;  %v1809_v2 = vld [vmem:[#allocation5] ss:$16 sps:$4 sm:$0xff]   ;;  %v1810_v3 = vld [vmem:[#allocation5 + $0x24] ss:$16 sps:$4 sm:$0xff]   ;;  %v1813_v6 = vld [vmem:[#allocation5 + $0xc] ss:$16 sps:$4 sm:$0xff]   ;;  %v82_v9 = vpack.c.bf16 %v81_v5, %v81_v5 }
  0x4c   :  { %157 = vmatprep.subr.bf16.mxu0 %v1807_v1  ;;  %v1812_v4 = vld [vmem:[#allocation5 + $0x20] ss:$16 sps:$4 sm:$0xff]   ;;  %v1815_v7 = vld [vmem:[#allocation5 + $0x8] ss:$16 sps:$4 sm:$0xff]   ;;  %198 = vmatprep.subr.bf16.mxu1 %v1813_v6  ;;  %v1816_v8 = vld [vmem:[#allocation5 + $0x2c] ss:$16 sps:$4 sm:$0xff]  }
  0x4d   :  { %158 = vmatpush1.bf16.msra.mxu0 %v1809_v2  ;;  %199 = vmatpush1.bf16.msra.mxu1 %v1815_v7  ;;  %v1818_v10 = vld [vmem:[#allocation5 + $0x28] ss:$16 sps:$4 sm:$0xff]   ;;  %v1821_v11 = vld [vmem:[#allocation7 + $0x4] ss:$16 sps:$4 sm:$0xff]   ;;  %vm153_vm0 = vcmask 261120   ;;  %s2170_s29 = smov [#allocation10]  }
  0x4e   :  { %159 = vmatprep.subr.bf16.mxu0 %v1810_v3  ;;  %200 = vmatprep.subr.bf16.mxu1 %v1816_v8  ;;  %v1819_v12 = vld [vmem:[#allocation7] ss:$16 sps:$4 sm:$0xff]   ;;  %v1824_v13 = vld [vmem:[#allocation7 + $0xc] ss:$16 sps:$4 sm:$0xff]   ;;  %v1827_v14 = vld [vmem:[#allocation7 + $0x24] ss:$16 sps:$4 sm:$0xff]  }
  0x4f   :  { %v1822_v15 = vld [vmem:[#allocation7 + $0x8] ss:$16 sps:$4 sm:$0xff]   ;;  %v1825_v16 = vld [vmem:[#allocation7 + $0x20] ss:$16 sps:$4 sm:$0xff]   ;;  %v1830_v17 = vld [vmem:[#allocation7 + $0x2c] ss:$16 sps:$4 sm:$0xff]  }
  0x50   :  { %v1833_v18 = vld [vmem:[#allocation7 + $0x44] ss:$16 sps:$4 sm:$0xff]   ;;  %v1828_v19 = vld [vmem:[#allocation7 + $0x28] ss:$16 sps:$4 sm:$0xff]   ;;  %v1831_v20 = vld [vmem:[#allocation7 + $0x40] ss:$16 sps:$4 sm:$0xff]  }
  0x51   :  { %160 = vmatpush1.bf16.msra.mxu0 %v1812_v4  ;;  %201 = vmatpush1.bf16.msra.mxu1 %v1818_v10  ;;  %v1836_v21 = vld [vmem:[#allocation7 + $0x4c] ss:$16 sps:$4 sm:$0xff]   ;;  %v1839_v22 = vld [vmem:[#allocation7 + $0x64] ss:$16 sps:$4 sm:$0xff]   ;;  %v1834_v23 = vld [vmem:[#allocation7 + $0x48] ss:$16 sps:$4 sm:$0xff]  }
  0x52   :  { %1037 = vmatprep.subr.bf16.mxu0 %v1821_v11  ;;  %1119 = vmatprep.subr.bf16.mxu1 %v1824_v13  ;;  %v1837_v24 = vld [vmem:[#allocation7 + $0x60] ss:$16 sps:$4 sm:$0xff]   ;;  %v1842_v25 = vld [vmem:[#allocation7 + $0x6c] ss:$16 sps:$4 sm:$0xff]   ;;  %v1845_v26 = vld [vmem:[#allocation7 + $0x84] ss:$16 sps:$4 sm:$0xff]   ;;  %v93_v13 = vlaneseq }
  0x53   :  { %v1840_v27 = vld [vmem:[#allocation7 + $0x68] ss:$16 sps:$4 sm:$0xff]   ;;  %v1843_v28 = vld [vmem:[#allocation7 + $0x80] ss:$16 sps:$4 sm:$0xff]   ;;  %v1848_v29 = vld [vmem:[#allocation7 + $0x8c] ss:$16 sps:$4 sm:$0xff]  }
  0x54   :  { %1578 = vmatmul.mubr.msk.bf16.vlgmr.msra.gmra.mrb[0].mxu0 %vm153_vm0, %v82_v9  ;;  %1579 = vmatmul.mubr.msk.bf16.vlgmr.msra.gmra.mrb[0].mxu1 %vm153_vm0, %v82_v9  ;;  %v1851_v30 = vld [vmem:[#allocation7 + $0xa4] ss:$16 sps:$4 sm:$0xff]   ;;  %v1846_v31 = vld [vmem:[#allocation7 + $0x88] ss:$16 sps:$4 sm:$0xff]   ;;  %v1849_v32 = vld [vmem:[#allocation7 + $0xa0] ss:$16 sps:$4 sm:$0xff]  }
  0x55   :  { %1038 = vmatpush1.bf16.msra.mxu0 %v1819_v12  ;;  %1120 = vmatpush1.bf16.msra.mxu1 %v1822_v15  ;;  %v1854_v33 = vld [vmem:[#allocation7 + $0xac] ss:$16 sps:$4 sm:$0xff]   ;;  %v1857_v34 = vld [vmem:[#allocation7 + $0xc4] ss:$16 sps:$4 sm:$0xff]   ;;  %v1852_v35 = vld [vmem:[#allocation7 + $0xa8] ss:$16 sps:$4 sm:$0xff]  }
  0x56   :  { %1039 = vmatprep.subr.bf16.mxu0 %v1827_v14  ;;  %1121 = vmatprep.subr.bf16.mxu1 %v1830_v17  ;;  %v1855_v36 = vld [vmem:[#allocation7 + $0xc0] ss:$16 sps:$4 sm:$0xff]   ;;  %v1860_v37 = vld [vmem:[#allocation7 + $0xcc] ss:$16 sps:$4 sm:$0xff]   ;;  %v1863_v38 = vld [vmem:[#allocation7 + $0xe4] ss:$16 sps:$4 sm:$0xff]  }
  0x57   :  { %v1858_v39 = vld [vmem:[#allocation7 + $0xc8] ss:$16 sps:$4 sm:$0xff]   ;;  %v1861_v40 = vld [vmem:[#allocation7 + $0xe0] ss:$16 sps:$4 sm:$0xff]   ;;  %v1866_v41 = vld [vmem:[#allocation7 + $0xec] ss:$16 sps:$4 sm:$0xff]  }
  0x58   :  { %v1869_v42 = vld [vmem:[#allocation7 + $0x104] ss:$16 sps:$4 sm:$0xff]   ;;  %v1864_v43 = vld [vmem:[#allocation7 + $0xe8] ss:$16 sps:$4 sm:$0xff]   ;;  %v1867_v44 = vld [vmem:[#allocation7 + $0x100] ss:$16 sps:$4 sm:$0xff]  }
  0x59   :  { %1040 = vmatpush1.bf16.msra.mxu0 %v1825_v16  ;;  %1122 = vmatpush1.bf16.msra.mxu1 %v1828_v19  ;;  %v1872_v45 = vld [vmem:[#allocation7 + $0x10c] ss:$16 sps:$4 sm:$0xff]   ;;  %v1875_v46 = vld [vmem:[#allocation7 + $0x124] ss:$16 sps:$4 sm:$0xff]   ;;  %v1870_v47 = vld [vmem:[#allocation7 + $0x108] ss:$16 sps:$4 sm:$0xff]  }
  0x5a   :  { %1041 = vmatprep.subr.bf16.mxu0 %v1833_v18  ;;  %1123 = vmatprep.subr.bf16.mxu1 %v1836_v21  ;;  %v1873_v48 = vld [vmem:[#allocation7 + $0x120] ss:$16 sps:$4 sm:$0xff]   ;;  %v1878_v49 = vld [vmem:[#allocation7 + $0x12c] ss:$16 sps:$4 sm:$0xff]   ;;  %v1881_v50 = vld [vmem:[#allocation7 + $0x144] ss:$16 sps:$4 sm:$0xff]  }
  0x5b   :  { %v1876_v51 = vld [vmem:[#allocation7 + $0x128] ss:$16 sps:$4 sm:$0xff]   ;;  %v1879_v52 = vld [vmem:[#allocation7 + $0x140] ss:$16 sps:$4 sm:$0xff]   ;;  %v1884_v53 = vld [vmem:[#allocation7 + $0x14c] ss:$16 sps:$4 sm:$0xff]  }
  0x5c   :  { %v1887_v54 = vld [vmem:[#allocation7 + $0x164] ss:$16 sps:$4 sm:$0xff]   ;;  %v1882_v55 = vld [vmem:[#allocation7 + $0x148] ss:$16 sps:$4 sm:$0xff]   ;;  %v1885_v56 = vld [vmem:[#allocation7 + $0x160] ss:$16 sps:$4 sm:$0xff]  }
  0x5d   :  { %1042 = vmatpush1.bf16.msra.mxu0 %v1831_v20  ;;  %1124 = vmatpush1.bf16.msra.mxu1 %v1834_v23  ;;  %v1890_v57 = vld [vmem:[#allocation7 + $0x16c] ss:$16 sps:$4 sm:$0xff]   ;;  %v1893_v58 = vld [vmem:[#allocation7 + $0x184] ss:$16 sps:$4 sm:$0xff]   ;;  %v1888_v59 = vld [vmem:[#allocation7 + $0x168] ss:$16 sps:$4 sm:$0xff]  }
  0x5e   :  { %1043 = vmatprep.subr.bf16.mxu0 %v1839_v22  ;;  %1125 = vmatprep.subr.bf16.mxu1 %v1842_v25  ;;  %v1891_v60 = vld [vmem:[#allocation7 + $0x180] ss:$16 sps:$4 sm:$0xff]   ;;  %v1896_v61 = vld [vmem:[#allocation7 + $0x18c] ss:$16 sps:$4 sm:$0xff]   ;;  %v1899_v62 = vld [vmem:[#allocation7 + $0x1a4] ss:$16 sps:$4 sm:$0xff]  }
  0x5f   :  { %v1894_v63 = vld [vmem:[#allocation7 + $0x188] ss:$16 sps:$4 sm:$0xff]   ;;  %v1897_v0 = vld [vmem:[#allocation7 + $0x1a0] ss:$16 sps:$4 sm:$0xff]   ;;  %v1902_v1 = vld [vmem:[#allocation7 + $0x1ac] ss:$16 sps:$4 sm:$0xff]  }
  0x60   :  { %v1900_v2 = vld [vmem:[#allocation7 + $0x1a8] ss:$16 sps:$4 sm:$0xff]   ;;  %v1905_v3 = vld [vmem:[#allocation7 + $0x1c4] ss:$16 sps:$4 sm:$0xff]   ;;  %v1908_v4 = vld [vmem:[#allocation7 + $0x1cc] ss:$16 sps:$4 sm:$0xff]  }
  0x61   :  { %1044 = vmatpush1.bf16.msra.mxu0 %v1837_v24  ;;  %1126 = vmatpush1.bf16.msra.mxu1 %v1840_v27  ;;  %v1903_v5 = vld [vmem:[#allocation7 + $0x1c0] ss:$16 sps:$4 sm:$0xff]   ;;  %v1906_v6 = vld [vmem:[#allocation7 + $0x1c8] ss:$16 sps:$4 sm:$0xff]   ;;  %v1911_v7 = vld [vmem:[#allocation7 + $0x1e4] ss:$16 sps:$4 sm:$0xff]  }
  0x62   :  { %1045 = vmatprep.subr.bf16.mxu0 %v1845_v26  ;;  %1127 = vmatprep.subr.bf16.mxu1 %v1848_v29  ;;  %v1914_v8 = vld [vmem:[#allocation7 + $0x1ec] ss:$16 sps:$4 sm:$0xff]   ;;  %v1909_v9 = vld [vmem:[#allocation7 + $0x1e0] ss:$16 sps:$4 sm:$0xff]   ;;  %v1912_v10 = vld [vmem:[#allocation7 + $0x1e8] ss:$16 sps:$4 sm:$0xff]  }
  0x63   :  { %v1917_v11 = vld [vmem:[#allocation7 + $0x204] ss:$16 sps:$4 sm:$0xff]   ;;  %v1920_v12 = vld [vmem:[#allocation7 + $0x20c] ss:$16 sps:$4 sm:$0xff]   ;;  %v2265_v14 = vshrl.u32 %v93_v13, 7  ;;  %s1559_s30 = sshll.u32 %s2170_s29, 4  ;;  %s1560_s30 = int_to_ptr.vmem [resolvable:$true] %s1559_s30 }
  0x64   :  { %v2271_v16 = vld [vmem:[%s2319_s2] sm:$0xf]  ;;  %v1977_v13 = vld [vmem:[#allocation7 + $0x344] ss:$16 sps:$4 sm:$0xff]   ;;  %s2131_s8 = scalar_lea.vmem %s1560_s30, 128  ;;  %p2136_p5 = scmp.lt.s32.totalorder %s1560_s30, %s1560_s30 }
  0x65   :  { %1046 = vmatpush1.bf16.msra.mxu0 %v1843_v28  ;;  %1128 = vmatpush1.bf16.msra.mxu1 %v1846_v31  ;;  %v95_v15 = vsub.s32 0, %v2265_v14  ;;  %v99_v17 = vsub.s32 1, %v2265_v14  ;;  %v107_v19 = vsub.s32 3, %v2265_v14  ;;  %p2132_p4 = scmp.ne.s32.totalorder %s1560_s30, %s2131_s8  ;;  %p2137_p6 = scmp.lt.s32.totalorder %s2131_s8, %s2131_s8 }
  0x66   :  { %1047 = vmatprep.subr.bf16.mxu0 %v1851_v30  ;;  %1129 = vmatprep.subr.bf16.mxu1 %v1854_v33 }
  0x67   :  { %v96_v18 = vrot.slane %v2271_v16, %v95_v15  ;;  %v100_v20 = vrot.slane %v2271_v16, %v99_v17  ;;  %v108_v24 = vrot.slane %v2271_v16, %v107_v19  ;;  %p2138_p7 = por %p2137_p6, %p2136_p5 }
  0x69   :  { %1048 = vmatpush1.bf16.msra.mxu0 %v1849_v32  ;;  %1130 = vmatpush1.bf16.msra.mxu1 %v1852_v35  ;;  %v1915_v35 = vld [vmem:[#allocation7 + $0x200] ss:$16 sps:$4 sm:$0xff]   ;;  %p2139_p8 = pnand %p2138_p7, %p2132_p4 }
  0x6a   :  { %1049 = vmatprep.subr.bf16.mxu0 %v1857_v34  ;;  %1131 = vmatprep.subr.bf16.mxu1 %v1860_v37 }
  0x6d   :  { %1050 = vmatpush1.bf16.msra.mxu0 %v1855_v36  ;;  %1132 = vmatpush1.bf16.msra.mxu1 %v1858_v39  ;;  %v1918_v36 = vld [vmem:[#allocation7 + $0x208] ss:$16 sps:$4 sm:$0xff]   ;;  %v1923_v39 = vld [vmem:[#allocation7 + $0x224] ss:$16 sps:$4 sm:$0xff]  }
  0x6e   :  { %1051 = vmatprep.subr.bf16.mxu0 %v1863_v38  ;;  %1133 = vmatprep.subr.bf16.mxu1 %v1866_v41 }
  0x71   :  { %1052 = vmatpush1.bf16.msra.mxu0 %v1861_v40  ;;  %1134 = vmatpush1.bf16.msra.mxu1 %v1864_v43  ;;  %v1926_v40 = vld [vmem:[#allocation7 + $0x22c] ss:$16 sps:$4 sm:$0xff]   ;;  %v1921_v43 = vld [vmem:[#allocation7 + $0x220] ss:$16 sps:$4 sm:$0xff]  }
  0x72   :  { %1053 = vmatprep.subr.bf16.mxu0 %v1869_v42  ;;  %1135 = vmatprep.subr.bf16.mxu1 %v1872_v45  ;;  %v1929_v45 = vld [vmem:[#allocation7 + $0x244] ss:$16 sps:$4 sm:$0xff]  }
  0x75   :  { %1054 = vmatpush1.bf16.msra.mxu0 %v1867_v44  ;;  %1136 = vmatpush1.bf16.msra.mxu1 %v1870_v47  ;;  %v1924_v44 = vld [vmem:[#allocation7 + $0x228] ss:$16 sps:$4 sm:$0xff]   ;;  %v1927_v47 = vld [vmem:[#allocation7 + $0x240] ss:$16 sps:$4 sm:$0xff]  }
  0x76   :  { %1055 = vmatprep.subr.bf16.mxu0 %v1875_v46  ;;  %1137 = vmatprep.subr.bf16.mxu1 %v1878_v49  ;;  %v1932_v46 = vld [vmem:[#allocation7 + $0x24c] ss:$16 sps:$4 sm:$0xff]   ;;  %v1935_v49 = vld [vmem:[#allocation7 + $0x264] ss:$16 sps:$4 sm:$0xff]  }
  0x79   :  { %1056 = vmatpush1.bf16.msra.mxu0 %v1873_v48  ;;  %1138 = vmatpush1.bf16.msra.mxu1 %v1876_v51  ;;  %v1930_v48 = vld [vmem:[#allocation7 + $0x248] ss:$16 sps:$4 sm:$0xff]   ;;  %v1933_v51 = vld [vmem:[#allocation7 + $0x260] ss:$16 sps:$4 sm:$0xff]  }
  0x7a   :  { %1057 = vmatprep.subr.bf16.mxu0 %v1881_v50  ;;  %1139 = vmatprep.subr.bf16.mxu1 %v1884_v53  ;;  %v1938_v50 = vld [vmem:[#allocation7 + $0x26c] ss:$16 sps:$4 sm:$0xff]   ;;  %v1941_v53 = vld [vmem:[#allocation7 + $0x284] ss:$16 sps:$4 sm:$0xff]  }
  0x7d   :  { %1058 = vmatpush1.bf16.msra.mxu0 %v1879_v52  ;;  %1140 = vmatpush1.bf16.msra.mxu1 %v1882_v55  ;;  %v1936_v52 = vld [vmem:[#allocation7 + $0x268] ss:$16 sps:$4 sm:$0xff]   ;;  %v1939_v55 = vld [vmem:[#allocation7 + $0x280] ss:$16 sps:$4 sm:$0xff]  }
  0x7e   :  { %1059 = vmatprep.subr.bf16.mxu0 %v1887_v54  ;;  %1141 = vmatprep.subr.bf16.mxu1 %v1890_v57  ;;  %v1944_v54 = vld [vmem:[#allocation7 + $0x28c] ss:$16 sps:$4 sm:$0xff]   ;;  %v1947_v57 = vld [vmem:[#allocation7 + $0x2a4] ss:$16 sps:$4 sm:$0xff]  }
  0x81   :  { %1060 = vmatpush1.bf16.msra.mxu0 %v1885_v56  ;;  %1142 = vmatpush1.bf16.msra.mxu1 %v1888_v59  ;;  %v1942_v56 = vld [vmem:[#allocation7 + $0x288] ss:$16 sps:$4 sm:$0xff]   ;;  %v1945_v59 = vld [vmem:[#allocation7 + $0x2a0] ss:$16 sps:$4 sm:$0xff]  }
  0x82   :  { %1061 = vmatprep.subr.bf16.mxu0 %v1893_v58  ;;  %1143 = vmatprep.subr.bf16.mxu1 %v1896_v61  ;;  %v1950_v58 = vld [vmem:[#allocation7 + $0x2ac] ss:$16 sps:$4 sm:$0xff]   ;;  %v1953_v61 = vld [vmem:[#allocation7 + $0x2c4] ss:$16 sps:$4 sm:$0xff]  }
  0x85   :  { %1062 = vmatpush1.bf16.msra.mxu0 %v1891_v60  ;;  %1144 = vmatpush1.bf16.msra.mxu1 %v1894_v63  ;;  %v1948_v60 = vld [vmem:[#allocation7 + $0x2a8] ss:$16 sps:$4 sm:$0xff]   ;;  %v1951_v63 = vld [vmem:[#allocation7 + $0x2c0] ss:$16 sps:$4 sm:$0xff]  }
  0x86   :  { %1063 = vmatprep.subr.bf16.mxu0 %v1899_v62  ;;  %1145 = vmatprep.subr.bf16.mxu1 %v1902_v1  ;;  %v1956_v62 = vld [vmem:[#allocation7 + $0x2cc] ss:$16 sps:$4 sm:$0xff]   ;;  %v1959_v1 = vld [vmem:[#allocation7 + $0x2e4] ss:$16 sps:$4 sm:$0xff]  }
  0x89   :  { %1064 = vmatpush1.bf16.msra.mxu0 %v1897_v0  ;;  %1146 = vmatpush1.bf16.msra.mxu1 %v1900_v2  ;;  %v1954_v0 = vld [vmem:[#allocation7 + $0x2c8] ss:$16 sps:$4 sm:$0xff]   ;;  %v1962_v2 = vld [vmem:[#allocation7 + $0x2ec] ss:$16 sps:$4 sm:$0xff]  }
  0x8a   :  { %1065 = vmatprep.subr.bf16.mxu0 %v1905_v3  ;;  %1147 = vmatprep.subr.bf16.mxu1 %v1908_v4  ;;  %v1957_v3 = vld [vmem:[#allocation7 + $0x2e0] ss:$16 sps:$4 sm:$0xff]   ;;  %v1960_v4 = vld [vmem:[#allocation7 + $0x2e8] ss:$16 sps:$4 sm:$0xff]  }
  0x8d   :  { %1066 = vmatpush1.bf16.msra.mxu0 %v1903_v5  ;;  %1148 = vmatpush1.bf16.msra.mxu1 %v1906_v6  ;;  %v1965_v5 = vld [vmem:[#allocation7 + $0x304] ss:$16 sps:$4 sm:$0xff]   ;;  %v1968_v6 = vld [vmem:[#allocation7 + $0x30c] ss:$16 sps:$4 sm:$0xff]  }
  0x8e   :  { %1067 = vmatprep.subr.bf16.mxu0 %v1911_v7  ;;  %1149 = vmatprep.subr.bf16.mxu1 %v1914_v8  ;;  %v1963_v7 = vld [vmem:[#allocation7 + $0x300] ss:$16 sps:$4 sm:$0xff]   ;;  %v1966_v8 = vld [vmem:[#allocation7 + $0x308] ss:$16 sps:$4 sm:$0xff]  }
  0x91   :  { %1068 = vmatpush1.bf16.msra.mxu0 %v1909_v9  ;;  %1150 = vmatpush1.bf16.msra.mxu1 %v1912_v10  ;;  %v1971_v9 = vld [vmem:[#allocation7 + $0x324] ss:$16 sps:$4 sm:$0xff]   ;;  %v1974_v10 = vld [vmem:[#allocation7 + $0x32c] ss:$16 sps:$4 sm:$0xff]  }
  0x92   :  { %1078 = vmatprep.subr.bf16.mxu0 %v1917_v11  ;;  %1160 = vmatprep.subr.bf16.mxu1 %v1920_v12  ;;  %v1969_v11 = vld [vmem:[#allocation7 + $0x320] ss:$16 sps:$4 sm:$0xff]   ;;  %v1972_v12 = vld [vmem:[#allocation7 + $0x328] ss:$16 sps:$4 sm:$0xff]  }
 0x127   :  { %v191_v21 = vpop.f32.mrb[0].mxu0  ;;  %v2284_v29 = vpop.f32.mrb[0].mxu1 }
 0x128   :  { %v192_v22 = vadd.f32 %v191_v21, %v96_v18  ;;  %v193_v23 = vpop.f32.mrb[1].mxu0  ;;  %v234_v31 = vpop.f32.mrb[1].mxu1  ;;  %v1980_v18 = vld [vmem:[#allocation7 + $0x34c] ss:$16 sps:$4 sm:$0xff]   ;;  %v1978_v21 = vld [vmem:[#allocation7 + $0x348] ss:$16 sps:$4 sm:$0xff]  }
 0x129   :  { %v194_v25 = vadd.f32 %v193_v23, %v100_v20  ;;  %v195_v26 = vpop.f32.mrb[2].mxu0  ;;  %v235_v32 = vadd.f32 %v234_v31, %v108_v24  ;;  %v236_v33 = vpop.f32.mrb[2].mxu1  ;;  %v1975_v20 = vld [vmem:[#allocation7 + $0x340] ss:$16 sps:$4 sm:$0xff]   ;;  %v1986_v23 = vld [vmem:[#allocation7 + $0x36c] ss:$16 sps:$4 sm:$0xff]  }
 0x12a   :  { %v239_v27 = vmax.f32 %v192_v22, 0.0  ;;  %v196_v28 = vpop.f32.mrb[3].mxu0  ;;  %v237_v37 = vpop.f32.mrb[3].mxu1  ;;  %v1983_v22 = vld [vmem:[#allocation7 + $0x364] ss:$16 sps:$4 sm:$0xff]   ;;  %v103_v31 = vsub.s32 2, %v2265_v14 }
 0x12b   :  { %v240_v30 = vmax.f32 %v194_v25, 0.0  ;;  %v242_v41 = vmax.f32 %v235_v32, 0.0  ;;  %v1981_v24 = vld [vmem:[#allocation7 + $0x360] ss:$16 sps:$4 sm:$0xff]   ;;  %v1984_v25 = vld [vmem:[#allocation7 + $0x368] ss:$16 sps:$4 sm:$0xff]  }
 0x12c   :  { %v243_v38 = vpack.c.bf16 %v239_v27, %v239_v27  ;;  %v1989_v26 = vld [vmem:[#allocation7 + $0x384] ss:$16 sps:$4 sm:$0xff]   ;;  %v1992_v27 = vld [vmem:[#allocation7 + $0x38c] ss:$16 sps:$4 sm:$0xff]   ;;  %v1987_v28 = vld [vmem:[#allocation7 + $0x380] ss:$16 sps:$4 sm:$0xff]  }
 0x12d   :  { %v244_v34 = vpack.c.bf16 %v240_v30, %v240_v30  ;;  %v246_v42 = vpack.c.bf16 %v242_v41, %v242_v41  ;;  %v1990_v30 = vld [vmem:[#allocation7 + $0x388] ss:$16 sps:$4 sm:$0xff]   ;;  %v1995_v32 = vld [vmem:[#allocation7 + $0x3a4] ss:$16 sps:$4 sm:$0xff]   ;;  %v1998_v33 = vld [vmem:[#allocation7 + $0x3ac] ss:$16 sps:$4 sm:$0xff]  }
 0x12e   :  { %v2001_v37 = vld [vmem:[#allocation7 + $0x3c4] ss:$16 sps:$4 sm:$0xff]  }
 0x12f   :  { %1069 = vmatprep.mubr.bf16.mxu0 %v244_v34  ;;  %1151 = vmatprep.mubr.bf16.mxu1 %v244_v34  ;;  %v1993_v34 = vld [vmem:[#allocation7 + $0x3a0] ss:$16 sps:$4 sm:$0xff]  }
 0x130   :  { %1070 = vmatmul.mubr.bf16.vlgmr.msra.gmra.mrb[4].mxu0 %v243_v38  ;;  %1152 = vmatmul.mubr.bf16.vlgmr.msra.gmra.mrb[4].mxu1 %v243_v38  ;;  %v2004_v38 = vld [vmem:[#allocation7 + $0x3cc] ss:$16 sps:$4 sm:$0xff]  }
 0x131   :  { %1079 = vmatpush1.bf16.msra.mxu0 %v1915_v35  ;;  %1161 = vmatpush1.bf16.msra.mxu1 %v1918_v36  ;;  %v1996_v35 = vld [vmem:[#allocation7 + $0x3a8] ss:$16 sps:$4 sm:$0xff]   ;;  %v104_v36 = vrot.slane %v2271_v16, %v103_v31  ;;  %v2011_v16 = vld [vmem:[#allocation8 + $0x40] sm:$0xff]  }
 0x132   :  { %1080 = vmatprep.subr.bf16.mxu0 %v1923_v39  ;;  %1162 = vmatprep.subr.bf16.mxu1 %v1926_v40  ;;  %v1999_v39 = vld [vmem:[#allocation7 + $0x3c0] ss:$16 sps:$4 sm:$0xff]   ;;  %v2002_v40 = vld [vmem:[#allocation7 + $0x3c8] ss:$16 sps:$4 sm:$0xff]  }
 0x133   :  { %1110 = vmatprep.mubr.bf16.mxu0 %v246_v42  ;;  %1192 = vmatprep.mubr.bf16.mxu1 %v246_v42  ;;  %v233_v41 = vadd.f32 %v2284_v29, %v104_v36  ;;  %v2007_v42 = vld [vmem:[#allocation7 + $0x3e4] ss:$16 sps:$4 sm:$0xff]   ;;  %v2015_v29 = vld [vmem:[#allocation8 + $0x48] sm:$0xff]  }
 0x135   :  { %1081 = vmatpush1.bf16.msra.mxu0 %v1921_v43  ;;  %1163 = vmatpush1.bf16.msra.mxu1 %v1924_v44  ;;  %v2010_v43 = vld [vmem:[#allocation7 + $0x3ec] ss:$16 sps:$4 sm:$0xff]   ;;  %v2005_v44 = vld [vmem:[#allocation7 + $0x3e0] ss:$16 sps:$4 sm:$0xff]  }
 0x136   :  { %1082 = vmatprep.subr.bf16.mxu0 %v1929_v45  ;;  %1164 = vmatprep.subr.bf16.mxu1 %v1932_v46  ;;  %v2008_v45 = vld [vmem:[#allocation7 + $0x3e8] ss:$16 sps:$4 sm:$0xff]   ;;  %v241_v46 = vmax.f32 %v233_v41, 0.0 }
 0x139   :  { %1083 = vmatpush1.bf16.msra.mxu0 %v1927_v47  ;;  %1165 = vmatpush1.bf16.msra.mxu1 %v1930_v48  ;;  %v2012_v47 = vld [vmem:[#allocation8 + $0xc0] sm:$0xff]  }
 0x13a   :  { %1084 = vmatprep.subr.bf16.mxu0 %v1935_v49  ;;  %1166 = vmatprep.subr.bf16.mxu1 %v1938_v50  ;;  %v2013_v48 = vld [vmem:[#allocation8] sm:$0xff]   ;;  %v245_v50 = vpack.c.bf16 %v241_v46, %v241_v46 }
 0x13b   :  { %v2014_v49 = vld [vmem:[#allocation8 + $0x80] sm:$0xff]  }
 0x13d   :  { %1085 = vmatpush1.bf16.msra.mxu0 %v1933_v51  ;;  %1167 = vmatpush1.bf16.msra.mxu1 %v1936_v52  ;;  %v2016_v51 = vld [vmem:[#allocation8 + $0xc8] sm:$0xff]  }
 0x13e   :  { %1086 = vmatprep.subr.bf16.mxu0 %v1941_v53  ;;  %1168 = vmatprep.subr.bf16.mxu1 %v1944_v54  ;;  %v2017_v52 = vld [vmem:[#allocation8 + $0x8] sm:$0xff]   ;;  %v2019_v54 = vld [vmem:[#allocation8 + $0x50] sm:$0xff]  }
 0x13f   :  { %v2018_v53 = vld [vmem:[#allocation8 + $0x88] sm:$0xff]  }
 0x141   :  { %1087 = vmatpush1.bf16.msra.mxu0 %v1939_v55  ;;  %1169 = vmatpush1.bf16.msra.mxu1 %v1942_v56  ;;  %v2020_v55 = vld [vmem:[#allocation8 + $0xd0] sm:$0xff]  }
 0x142   :  { %1088 = vmatprep.subr.bf16.mxu0 %v1947_v57  ;;  %1170 = vmatprep.subr.bf16.mxu1 %v1950_v58  ;;  %v2021_v56 = vld [vmem:[#allocation8 + $0x10] sm:$0xff]   ;;  %v2023_v58 = vld [vmem:[#allocation8 + $0x58] sm:$0xff]  }
 0x143   :  { %v2022_v57 = vld [vmem:[#allocation8 + $0x90] sm:$0xff]  }
 0x145   :  { %1089 = vmatpush1.bf16.msra.mxu0 %v1945_v59  ;;  %1171 = vmatpush1.bf16.msra.mxu1 %v1948_v60  ;;  %v2024_v59 = vld [vmem:[#allocation8 + $0xd8] sm:$0xff]  }
 0x146   :  { %1090 = vmatprep.subr.bf16.mxu0 %v1953_v61  ;;  %1172 = vmatprep.subr.bf16.mxu1 %v1956_v62  ;;  %v2025_v60 = vld [vmem:[#allocation8 + $0x18] sm:$0xff]   ;;  %v2027_v62 = vld [vmem:[#allocation8 + $0x60] sm:$0xff]  }
 0x147   :  { %v2026_v61 = vld [vmem:[#allocation8 + $0x98] sm:$0xff]  }
 0x149   :  { %1091 = vmatpush1.bf16.msra.mxu0 %v1951_v63  ;;  %1173 = vmatpush1.bf16.msra.mxu1 %v1954_v0  ;;  %v2028_v63 = vld [vmem:[#allocation8 + $0xe0] sm:$0xff]  }
 0x14a   :  { %1092 = vmatprep.subr.bf16.mxu0 %v1959_v1  ;;  %1174 = vmatprep.subr.bf16.mxu1 %v1962_v2  ;;  %v2029_v0 = vld [vmem:[#allocation8 + $0x20] sm:$0xff]   ;;  %v2031_v2 = vld [vmem:[#allocation8 + $0x68] sm:$0xff]  }
 0x14b   :  { %v2030_v1 = vld [vmem:[#allocation8 + $0xa0] sm:$0xff]  }
 0x14d   :  { %1093 = vmatpush1.bf16.msra.mxu0 %v1957_v3  ;;  %1175 = vmatpush1.bf16.msra.mxu1 %v1960_v4  ;;  %v2032_v3 = vld [vmem:[#allocation8 + $0xe8] sm:$0xff]  }
 0x14e   :  { %1094 = vmatprep.subr.bf16.mxu0 %v1965_v5  ;;  %1176 = vmatprep.subr.bf16.mxu1 %v1968_v6  ;;  %v2033_v4 = vld [vmem:[#allocation8 + $0x28] sm:$0xff]   ;;  %v2035_v6 = vld [vmem:[#allocation8 + $0x70] sm:$0xff]  }
 0x14f   :  { %v2034_v5 = vld [vmem:[#allocation8 + $0xa8] sm:$0xff]  }
 0x151   :  { %1095 = vmatpush1.bf16.msra.mxu0 %v1963_v7  ;;  %1177 = vmatpush1.bf16.msra.mxu1 %v1966_v8  ;;  %v2036_v7 = vld [vmem:[#allocation8 + $0xf0] sm:$0xff]  }
 0x152   :  { %1096 = vmatprep.subr.bf16.mxu0 %v1971_v9  ;;  %1178 = vmatprep.subr.bf16.mxu1 %v1974_v10  ;;  %v2037_v8 = vld [vmem:[#allocation8 + $0x30] sm:$0xff]   ;;  %v2039_v10 = vld [vmem:[#allocation8 + $0x78] sm:$0xff]  }
 0x153   :  { %v2038_v9 = vld [vmem:[#allocation8 + $0xb0] sm:$0xff]  }
 0x155   :  { %1097 = vmatpush1.bf16.msra.mxu0 %v1969_v11  ;;  %1179 = vmatpush1.bf16.msra.mxu1 %v1972_v12  ;;  %v2040_v11 = vld [vmem:[#allocation8 + $0xf8] sm:$0xff]  }
 0x156   :  { %1098 = vmatprep.subr.bf16.mxu0 %v1977_v13  ;;  %1180 = vmatprep.subr.bf16.mxu1 %v1980_v18  ;;  %v2041_v12 = vld [vmem:[#allocation8 + $0x38] sm:$0xff]  }
 0x157   :  { %v2042_v13 = vld [vmem:[#allocation8 + $0xb8] sm:$0xff]  }
 0x158   :  { %v375_v18 = vld [vmem:[%s2321_s4] sm:$0xf] }
 0x159   :  { %1099 = vmatpush1.bf16.msra.mxu0 %v1975_v20  ;;  %1181 = vmatpush1.bf16.msra.mxu1 %v1978_v21  ;;  %v380_v20 = vrot.slane %v375_v18, %v95_v15  ;;  %v388_v21 = vrot.slane %v375_v18, %v103_v31 }
 0x15a   :  { %1100 = vmatprep.subr.bf16.mxu0 %v1983_v22  ;;  %1182 = vmatprep.subr.bf16.mxu1 %v1986_v23  ;;  %v384_v22 = vrot.slane %v375_v18, %v99_v17  ;;  %v392_v23 = vrot.slane %v375_v18, %v107_v19 }
 0x15d   :  { %1101 = vmatpush1.bf16.msra.mxu0 %v1981_v24  ;;  %1183 = vmatpush1.bf16.msra.mxu1 %v1984_v25 }
 0x15e   :  { %1102 = vmatprep.subr.bf16.mxu0 %v1989_v26  ;;  %1184 = vmatprep.subr.bf16.mxu1 %v1992_v27 }
 0x161   :  { %1103 = vmatpush1.bf16.msra.mxu0 %v1987_v28  ;;  %1185 = vmatpush1.bf16.msra.mxu1 %v1990_v30 }
 0x162   :  { %1104 = vmatprep.subr.bf16.mxu0 %v1995_v32  ;;  %1186 = vmatprep.subr.bf16.mxu1 %v1998_v33 }
 0x165   :  { %1105 = vmatpush1.bf16.msra.mxu0 %v1993_v34  ;;  %1187 = vmatpush1.bf16.msra.mxu1 %v1996_v35 }
 0x166   :  { %1106 = vmatprep.subr.bf16.mxu0 %v2001_v37  ;;  %1188 = vmatprep.subr.bf16.mxu1 %v2004_v38 }
 0x169   :  { %1107 = vmatpush1.bf16.msra.mxu0 %v1999_v39  ;;  %1189 = vmatpush1.bf16.msra.mxu1 %v2002_v40 }
 0x16a   :  { %1108 = vmatprep.subr.bf16.mxu0 %v2007_v42  ;;  %1190 = vmatprep.subr.bf16.mxu1 %v2010_v43  ;;  %v1708_v43 = vld [vmem:[%s2323_s6] ss:$0 sm:$0xff] }
 0x16d   :  { %1109 = vmatpush1.bf16.msra.mxu0 %v2005_v44  ;;  %1191 = vmatpush1.bf16.msra.mxu1 %v2008_v45 }
 0x16e   :  { %1741 = vmatprep.subr.bf16.mxu0 %v2011_v16  ;;  %1763 = vmatprep.subr.bf16.mxu1 %v2012_v47 }
 0x170   :  { %1111 = vmatmul.mubr.bf16.vlgmr.msra.gmra.mrb[4].mxu0 %v245_v50  ;;  %1193 = vmatmul.mubr.bf16.vlgmr.msra.gmra.mrb[4].mxu1 %v245_v50 }
 0x171   :  { %1742 = vmatpush3.bf16.msra.mxu0 %v2013_v48  ;;  %1764 = vmatpush3.bf16.msra.mxu1 %v2014_v49 }
 0x172   :  { %1743 = vmatprep.subr.bf16.mxu0 %v2015_v29  ;;  %1765 = vmatprep.subr.bf16.mxu1 %v2016_v51 }
 0x175   :  { %1744 = vmatpush3.bf16.msra.mxu0 %v2017_v52  ;;  %1766 = vmatpush3.bf16.msra.mxu1 %v2018_v53 }
 0x176   :  { %1745 = vmatprep.subr.bf16.mxu0 %v2019_v54  ;;  %1767 = vmatprep.subr.bf16.mxu1 %v2020_v55 }
 0x179   :  { %1746 = vmatpush3.bf16.msra.mxu0 %v2021_v56  ;;  %1768 = vmatpush3.bf16.msra.mxu1 %v2022_v57 }
 0x17a   :  { %1747 = vmatprep.subr.bf16.mxu0 %v2023_v58  ;;  %1769 = vmatprep.subr.bf16.mxu1 %v2024_v59 }
 0x17d   :  { %1748 = vmatpush3.bf16.msra.mxu0 %v2025_v60  ;;  %1770 = vmatpush3.bf16.msra.mxu1 %v2026_v61 }
 0x17e   :  { %1749 = vmatprep.subr.bf16.mxu0 %v2027_v62  ;;  %1771 = vmatprep.subr.bf16.mxu1 %v2028_v63 }
 0x181   :  { %1750 = vmatpush3.bf16.msra.mxu0 %v2029_v0  ;;  %1772 = vmatpush3.bf16.msra.mxu1 %v2030_v1 }
 0x182   :  { %1751 = vmatprep.subr.bf16.mxu0 %v2031_v2  ;;  %1773 = vmatprep.subr.bf16.mxu1 %v2032_v3 }
 0x185   :  { %1752 = vmatpush3.bf16.msra.mxu0 %v2033_v4  ;;  %1774 = vmatpush3.bf16.msra.mxu1 %v2034_v5 }
 0x186   :  { %1753 = vmatprep.subr.bf16.mxu0 %v2035_v6  ;;  %1775 = vmatprep.subr.bf16.mxu1 %v2036_v7 }
 0x189   :  { %1754 = vmatpush3.bf16.msra.mxu0 %v2037_v8  ;;  %1776 = vmatpush3.bf16.msra.mxu1 %v2038_v9 }
 0x18a   :  { %1755 = vmatprep.subr.bf16.mxu0 %v2039_v10  ;;  %1777 = vmatprep.subr.bf16.mxu1 %v2040_v11 }
 0x18d   :  { %1756 = vmatpush3.bf16.msra.mxu0 %v2041_v12  ;;  %1778 = vmatpush3.bf16.msra.mxu1 %v2042_v13 }
 0x243   :  { %v1112_v24 = vpop.f32.mrb[4].mxu0  ;;  %v1194_v25 = vpop.f32.mrb[4].mxu1 }
 0x244   :  { %v1785_v26 = vadd.f32 %v1112_v24, %v380_v20  ;;  %v1787_v27 = vadd.f32 %v1194_v25, %v388_v21  ;;  %v1114_v28 = vpop.f32.mrb[5].mxu0  ;;  %v1196_v30 = vpop.f32.mrb[5].mxu1 }
 0x245   :  { %v1786_v32 = vadd.f32 %v1114_v28, %v384_v22  ;;  %v1788_v33 = vadd.f32 %v1196_v30, %v392_v23  ;;  %v1116_v34 = vpop.f32.mrb[6].mxu0  ;;  %v1198_v35 = vpop.f32.mrb[6].mxu1 }
 0x246   :  { %v1201_v15 = vmax.f32 %v1785_v26, 0.0  ;;  %v1203_v36 = vmax.f32 %v1787_v27, 0.0  ;;  %v1117_v37 = vpop.f32.mrb[7].mxu0  ;;  %v1199_v31 = vpop.f32.mrb[7].mxu1 }
 0x247   :  { %v1202_v38 = vmax.f32 %v1786_v32, 0.0  ;;  %v1204_v39 = vmax.f32 %v1788_v33, 0.0 }
 0x248   :  { %v1205_v14 = vpack.c.bf16 %v1201_v15, %v1201_v15  ;;  %v1207_v19 = vpack.c.bf16 %v1203_v36, %v1203_v36 }
 0x249   :  { %v1206_v17 = vpack.c.bf16 %v1202_v38, %v1202_v38  ;;  %v1208_v40 = vpack.c.bf16 %v1204_v39, %v1204_v39 }
 0x24b   :  { %1504 = vmatprep.mubr.bf16.mxu0 %v1206_v17  ;;  %1544 = vmatprep.mubr.bf16.mxu1 %v1208_v40 }
 0x24c   :  { %1505 = vmatmul.mubr.bf16.vlgmr.msra.gmra.mrb[8].mxu0 %v1205_v14  ;;  %1545 = vmatmul.mubr.bf16.vlgmr.msra.gmra.mrb[8].mxu1 %v1207_v19 }
 0x31f   :  { %v1757_v41 = vpop.f32.mrb[8].mxu0  ;;  %v1779_v42 = vpop.f32.mrb[8].mxu1 }
 0x320   :  { %v1758_v44 = vpop.f32.mrb[9].mxu0  ;;  %v1780_v45 = vpop.f32.mrb[9].mxu1 }
 0x321   :  { %v1759_v46 = vadd.f32 %v1758_v44, %v1757_v41  ;;  %v1781_v16 = vadd.f32 %v1780_v45, %v1779_v42  ;;  %v1760_v47 = vpop.f32.mrb[10].mxu0  ;;  %v1782_v48 = vpop.f32.mrb[10].mxu1 }
 0x322   :  { %v1761_v49 = vpop.f32.mrb[11].mxu0  ;;  %v1783_v50 = vpop.f32.mrb[11].mxu1 }
 0x323   :  { %v1507_v29 = vadd.f32 %v1759_v46, %v1708_v43 }
 0x325   :  { %v1547_v51 = vadd.f32 %v1781_v16, %v1507_v29 }
 0x327   :  { %1552 = vst [vmem:[#allocation10] sm:$0xff] %v1547_v51 }
 0x328   :  { %2142 = shalt.err (!%p2139_p8)
}
 0x329   :  { %s2143_s10 = scalar_lea.hbm %s2324_s7, 128 }
 0x32a   :  { %p2144_p9 = scmp.ne.s32.totalorder %s2324_s7, %s2143_s10  ;;  %p2147_p10 = scmp.lt.u32.totalorder %s2143_s10, %s2324_s7 }
 0x32c   :  { %p2149_p11 = pnand %p2147_p10, %p2144_p9 }
 0x32e   :  { %2152 = shalt.err (!%p2149_p11)
}
 0x32f   :  { %1562 = dma.vmem_to_hbm [thread:$0]  %s1560_s30, 128, %s2324_s7, [#allocation4]  }
 0x330   :  { %2159 = dma.done.wait [#allocation4], 128  }
 0x331   :  { %2160 = vsyncadd [#allocation4], 4294967168 }
 0x332   :  { %1566 = vsyncpa [#allocation3], 1 }
 0x333   :  { %1567 = vsyncpa [#allocation6], 1 }
 0x334   :  { %1568 = vsyncpa [#allocation9], 1 }
 0x335   :  { %1569 = vsyncpa [#allocation4], 1 }

</bundles_post_ra>
